<compile_context>
chip_gen: v6e
topology: v6e:2x2x1
jax: 0.10.0
libtpu: 0.0.40
codegen_flags: <defaults>
</compile_context>

<pallas_src>
import functools

import jax
import jax.numpy as jnp
from jax import lax
from jax.experimental import pallas as pl
from jax.experimental.pallas import tpu as pltpu


def _self_attention_kernel(x_ref, mc_ref, mr_ref, wqkv_ref, wu_ref, b_ref,
                           o_ref, *, heads, matmul_dtype):
    t, e = x_ref.shape[1], x_ref.shape[2]
    he = heads * e

    x = x_ref[0].astype(matmul_dtype)                       # (T, E)
    wqkv = wqkv_ref[...].astype(matmul_dtype)               # (E, 3*H*E), resident

    # Fused Q/K/V projection: one wide MXU matmul, f32 accumulation.
    qkv = jnp.dot(x, wqkv, preferred_element_type=jnp.float32)   # (T, 3*H*E)

    # Attention scale applied once (equivalent to scaling q and k by e**-0.25).
    q_all = qkv[:, :he] * (e ** -0.5)                        # (T, H*E) f32
    k_all = qkv[:, he:2 * he]                                # (T, H*E) f32
    v_all = qkv[:, 2 * he:]                                  # (T, H*E) f32

    # Padding mask: outer product of the binary mask as a VPU broadcast select
    # (mask_row pre-transposed in the wrapper; never touches the MXU/XLU).
    valid = (mc_ref[0] > 0.0) & (mr_ref[0] > 0.0)            # (T,1)&(1,T)->(T,T)
    neg_big = jnp.float32(-1e30)

    head_outs = []
    for h in range(heads):                                   # static unrolled loop
        sl = slice(h * e, (h + 1) * e)
        qh = q_all[:, sl].astype(matmul_dtype)
        kh = k_all[:, sl].astype(matmul_dtype)
        # NT dot_general contracting feature dims (no explicit transpose).
        scores = lax.dot_general(qh, kh,
                                 dimension_numbers=(((1,), (1,)), ((), ())),
                                 preferred_element_type=jnp.float32)  # (T, T)
        logits = jnp.where(valid, scores, neg_big)
        lmax = jnp.max(logits, axis=-1, keepdims=True)
        p = jnp.exp(logits - lmax)
        denom = jnp.sum(p, axis=-1, keepdims=True)
        att = p * pl.reciprocal(denom, approx=False)         # exact normalizer
        vh = v_all[:, sl].astype(matmul_dtype)
        head_outs.append(jnp.dot(att.astype(matmul_dtype), vh,
                                 preferred_element_type=jnp.float32))  # (T, E)

    # Concatenate heads and do ONE unify matmul with K = H*E (fills the MXU
    # contraction dim) instead of H separate K=E matmuls.
    heads_cat = jnp.concatenate(head_outs, axis=-1)          # (T, H*E)
    wu = wu_ref[...].astype(matmul_dtype)                    # (H*E, E), resident
    out = jnp.dot(heads_cat.astype(matmul_dtype), wu,
                  preferred_element_type=jnp.float32)        # (T, E)
    out = out + b_ref[...].astype(jnp.float32)               # bias folded in

    # Single write of the output block per grid step (no RMW over heads).
    o_ref[...] = out[None].astype(o_ref.dtype)


def self_attention(x, mask_idx, wq, wk, wv, wu, bias, *,
                   matmul_dtype=jnp.bfloat16):
    """Pallas implementation of SelfAttention.forward (mask=False variant).

    x: (B, T, E); mask_idx: (B, T, 1) binary; wq/wk/wv/wu: (H, E, E) where
    w*[h] is the math-layout per-head projection (x @ w*[h]); bias: (E,).
    Returns (B, T, E) float32.
    """
    B, T, E = x.shape
    H = wq.shape[0]
    assert wq.shape == wk.shape == wv.shape == wu.shape == (H, E, E)
    assert mask_idx.shape == (B, T, 1)
    assert bias.shape == (E,)
    HE = H * E

    # Pack per-head projection weights into one fused (E, 3*H*E) QKV weight
    # so the kernel does a single wide projection matmul per step.
    wq_full = jnp.transpose(wq, (1, 0, 2)).reshape(E, HE)
    wk_full = jnp.transpose(wk, (1, 0, 2)).reshape(E, HE)
    wv_full = jnp.transpose(wv, (1, 0, 2)).reshape(E, HE)
    wqkv = jnp.concatenate([wq_full, wk_full, wv_full], axis=-1)   # (E, 3*H*E)
    wu_full = wu.reshape(HE, E)                                    # (H*E, E)

    mask_col = mask_idx.astype(jnp.float32)                  # (B, T, 1)
    mask_row = jnp.transpose(mask_col, (0, 2, 1))            # (B, 1, T)
    bias2d = bias.reshape(1, E).astype(jnp.float32)

    kernel = functools.partial(_self_attention_kernel,
                               heads=H, matmul_dtype=matmul_dtype)

    return pl.pallas_call(
        kernel,
        out_shape=jax.ShapeDtypeStruct((B, T, E), jnp.float32),
        grid=(B,),
        in_specs=[
            pl.BlockSpec((1, T, E), lambda b: (b, 0, 0)),    # x
            pl.BlockSpec((1, T, 1), lambda b: (b, 0, 0)),    # mask (column form)
            pl.BlockSpec((1, 1, T), lambda b: (b, 0, 0)),    # mask (row form)
            pl.BlockSpec((E, 3 * HE), lambda b: (0, 0)),     # fused QKV weight (resident)
            pl.BlockSpec((HE, E), lambda b: (0, 0)),         # unify weight (resident)
            pl.BlockSpec((1, E), lambda b: (0, 0)),          # unify bias
        ],
        out_specs=pl.BlockSpec((1, T, E), lambda b: (b, 0, 0)),
        compiler_params=pltpu.CompilerParams(
            dimension_semantics=("parallel",),
            vmem_limit_bytes=32 * 1024 * 1024),
    )(x, mask_col, mask_row, wqkv, wu_full, bias2d)


def _self_attention_ref(x, mask_idx, wq, wk, wv, wu, bias):
    """Pure-JAX reference mirroring the PyTorch forward (mask=False)."""
    B, T, E = x.shape
    s = E ** 0.25
    q = jnp.einsum("bte,hef->bhtf", x, wq) / s
    k = jnp.einsum("bte,hef->bhtf", x, wk) / s
    v = jnp.einsum("bte,hef->bhtf", x, wv)
    dot = jnp.einsum("bhqf,bhkf->bhqk", q, k)
    m2 = jnp.einsum("bqi,bki->bqk", mask_idx, mask_idx)[:, None]   # (B,1,T,T)
    logits = dot * m2 + (1.0 - m2) * -1e30
    att = jax.nn.softmax(logits, axis=-1)
    heads = jnp.einsum("bhqk,bhkf->bhqf", att, v)
    return jnp.einsum("bhqf,hfe->bqe", heads, wu) + bias


if __name__ == "__main__":
    B, T, E, H = 2, 8, 32, 8

    key = jax.random.PRNGKey(0)
    kx, kq, kk, kv, ku, kb = jax.random.split(key, 6)

    x = jax.random.normal(kx, (B, T, E), dtype=jnp.float32)

    bound_in = 1.0 / (E ** 0.5)
    bound_unify = 1.0 / ((H * E) ** 0.5)
    wq = jax.random.uniform(kq, (H, E, E), jnp.float32, -bound_in, bound_in)
    wk = jax.random.uniform(kk, (H, E, E), jnp.float32, -bound_in, bound_in)
    wv = jax.random.uniform(kv, (H, E, E), jnp.float32, -bound_in, bound_in)
    wu = jax.random.uniform(ku, (H, E, E), jnp.float32, -bound_unify, bound_unify)
    bias = jax.random.uniform(kb, (E,), jnp.float32, -bound_unify, bound_unify)

    # Deterministic binary padding mask: batch 0 valid for 6 positions,
    # batch 1 valid for 5 positions.
    pos = jnp.arange(T)[None, :, None]                       # (1, T, 1)
    valid_len = jnp.array([6, 5])[:, None, None]             # (B, 1, 1)
    mask_idx = (pos < valid_len).astype(jnp.float32)         # (B, T, 1)

    ref = _self_attention_ref(x, mask_idx, wq, wk, wv, wu, bias)

    # Exact (f32 MXU feeds) path: tight tolerance vs the reference.
    out_f32 = self_attention(x, mask_idx, wq, wk, wv, wu, bias,
                             matmul_dtype=jnp.float32)
    out_f32 = jax.block_until_ready(out_f32)
    assert out_f32.shape == (B, T, E)
    assert jnp.allclose(out_f32, ref, atol=1e-4, rtol=1e-4), \
        "f32 kernel mismatch vs reference"

    # Production path: bf16 MXU feeds with f32 accumulation (default).
    out_bf16 = self_attention(x, mask_idx, wq, wk, wv, wu, bias)
    out_bf16 = jax.block_until_ready(out_bf16)
    assert jnp.allclose(out_bf16, ref, atol=5e-2, rtol=5e-2), \
        "bf16 kernel mismatch vs reference"

    print("KERNEL_OK")
</pallas_src>

<mosaic_0001>
module attributes {stable_mosaic.version = 11 : i64} {
  func.func @_self_attention_kernel(%arg0: i32, %arg1: memref<1x8x32xf32, #tpu.memory_space<vmem>>, %arg2: memref<1x8x1xf32, #tpu.memory_space<vmem>>, %arg3: memref<1x1x8xf32, #tpu.memory_space<vmem>>, %arg4: memref<32x768xf32, #tpu.memory_space<vmem>>, %arg5: memref<256x32xf32, #tpu.memory_space<vmem>>, %arg6: memref<1x32xf32, #tpu.memory_space<vmem>>, %arg7: memref<1x8x32xf32, #tpu.memory_space<vmem>>) attributes {dimension_semantics = [#tpu.dimension_semantics<parallel>], iteration_bounds = array<i64: 2>, scalar_prefetch = 0 : i64, scratch_operands = 0 : i64, tpu.core_type = #tpu.core_type<tc>, window_params = [{transform_indices = @transform_0, window_bounds = array<i64: 1, 8, 32>}, {transform_indices = @transform_1, window_bounds = array<i64: 1, 8, 1>}, {transform_indices = @transform_2, window_bounds = array<i64: 1, 1, 8>}, {pipeline_mode = #tpu.pipeline_mode<synchronous>, transform_indices = @transform_3, window_bounds = array<i64: 32, 768>}, {pipeline_mode = #tpu.pipeline_mode<synchronous>, transform_indices = @transform_4, window_bounds = array<i64: 256, 32>}, {pipeline_mode = #tpu.pipeline_mode<synchronous>, transform_indices = @transform_5, window_bounds = array<i64: 1, 32>}, {transform_indices = @transform_6, window_bounds = array<i64: 1, 8, 32>}]} {
    %c0 = arith.constant 0 : index
    %c0_0 = arith.constant 0 : index
    %c0_1 = arith.constant 0 : index
    %0 = vector.load %arg1[%c0, %c0_0, %c0_1] : memref<1x8x32xf32, #tpu.memory_space<vmem>>, vector<1x8x32xf32>
    %1 = vector.shape_cast %0 : vector<1x8x32xf32> to vector<8x32xf32>
    %c0_2 = arith.constant 0 : index
    %c0_3 = arith.constant 0 : index
    %2 = vector.load %arg4[%c0_2, %c0_3] : memref<32x768xf32, #tpu.memory_space<vmem>>, vector<32x768xf32>
    %cst = arith.constant dense<0.000000e+00> : vector<8x768xf32>
    %3 = tpu.matmul %1, %2, %cst {dimension_numbers = #tpu.dot_dimension_numbers<[1], [0], [0], [1], [0, 0, 1, 1], [], []>} : vector<8x32xf32>, vector<32x768xf32>, vector<8x768xf32> -> vector<8x768xf32>
    %4 = vector.extract_strided_slice %3 {offsets = [0, 0], sizes = [8, 256], strides = [1, 1]} : vector<8x768xf32> to vector<8x256xf32>
    %cst_4 = arith.constant 0.176776692 : f32
    %5 = vector.broadcast %cst_4 : f32 to vector<8x256xf32>
    %6 = arith.mulf %4, %5 : vector<8x256xf32>
    %7 = vector.extract_strided_slice %3 {offsets = [0, 256], sizes = [8, 256], strides = [1, 1]} : vector<8x768xf32> to vector<8x256xf32>
    %8 = vector.extract_strided_slice %3 {offsets = [0, 512], sizes = [8, 256], strides = [1, 1]} : vector<8x768xf32> to vector<8x256xf32>
    %c0_5 = arith.constant 0 : index
    %c0_6 = arith.constant 0 : index
    %c0_7 = arith.constant 0 : index
    %9 = vector.load %arg2[%c0_5, %c0_6, %c0_7] : memref<1x8x1xf32, #tpu.memory_space<vmem>>, vector<1x8x1xf32>
    %10 = vector.shape_cast %9 : vector<1x8x1xf32> to vector<8x1xf32>
    %cst_8 = arith.constant 0.000000e+00 : f32
    %11 = vector.broadcast %cst_8 : f32 to vector<8x1xf32>
    %12 = arith.cmpf ogt, %10, %11 : vector<8x1xf32>
    %c0_9 = arith.constant 0 : index
    %c0_10 = arith.constant 0 : index
    %c0_11 = arith.constant 0 : index
    %13 = vector.load %arg3[%c0_9, %c0_10, %c0_11] : memref<1x1x8xf32, #tpu.memory_space<vmem>>, vector<1x1x8xf32>
    %14 = vector.shape_cast %13 : vector<1x1x8xf32> to vector<1x8xf32>
    %cst_12 = arith.constant 0.000000e+00 : f32
    %15 = vector.broadcast %cst_12 : f32 to vector<1x8xf32>
    %16 = arith.cmpf ogt, %14, %15 : vector<1x8xf32>
    %17 = vector.broadcast %12 : vector<8x1xi1> to vector<8x8xi1>
    %18 = vector.broadcast %16 : vector<1x8xi1> to vector<8x8xi1>
    %19 = arith.andi %17, %18 : vector<8x8xi1>
    %20 = vector.extract_strided_slice %6 {offsets = [0, 0], sizes = [8, 32], strides = [1, 1]} : vector<8x256xf32> to vector<8x32xf32>
    %21 = vector.extract_strided_slice %7 {offsets = [0, 0], sizes = [8, 32], strides = [1, 1]} : vector<8x256xf32> to vector<8x32xf32>
    %cst_13 = arith.constant dense<0.000000e+00> : vector<8x8xf32>
    %22 = tpu.matmul %20, %21, %cst_13 {dimension_numbers = #tpu.dot_dimension_numbers<[1], [1], [0], [0], [0, 0, 1, 0], [], []>} : vector<8x32xf32>, vector<8x32xf32>, vector<8x8xf32> -> vector<8x8xf32>
    %cst_14 = arith.constant -1.000000e+30 : f32
    %23 = vector.broadcast %cst_14 : f32 to vector<8x8xf32>
    %24 = arith.select %19, %22, %23 : vector<8x8xi1>, vector<8x8xf32>
    %cst_15 = arith.constant dense<0xFF800000> : vector<8xf32>
    %25 = vector.multi_reduction <maximumf>, %24, %cst_15 [1] : vector<8x8xf32> to vector<8xf32>
    %26 = vector.shape_cast %25 : vector<8xf32> to vector<8x1xf32>
    %27 = vector.broadcast %26 : vector<8x1xf32> to vector<8x8xf32>
    %28 = arith.subf %24, %27 : vector<8x8xf32>
    %29 = math.exp %28 : vector<8x8xf32>
    %cst_16 = arith.constant dense<0.000000e+00> : vector<8xf32>
    %30 = vector.multi_reduction <add>, %29, %cst_16 [1] : vector<8x8xf32> to vector<8xf32>
    %31 = vector.shape_cast %30 : vector<8xf32> to vector<8x1xf32>
    %32 = tpu.reciprocal %31 : vector<8x1xf32> -> vector<8x1xf32>
    %33 = vector.broadcast %32 : vector<8x1xf32> to vector<8x8xf32>
    %34 = arith.mulf %29, %33 : vector<8x8xf32>
    %35 = vector.extract_strided_slice %8 {offsets = [0, 0], sizes = [8, 32], strides = [1, 1]} : vector<8x256xf32> to vector<8x32xf32>
    %cst_17 = arith.constant dense<0.000000e+00> : vector<8x32xf32>
    %36 = tpu.matmul %34, %35, %cst_17 {dimension_numbers = #tpu.dot_dimension_numbers<[1], [0], [0], [1], [0, 0, 1, 1], [], []>} : vector<8x8xf32>, vector<8x32xf32>, vector<8x32xf32> -> vector<8x32xf32>
    %37 = vector.extract_strided_slice %6 {offsets = [0, 32], sizes = [8, 32], strides = [1, 1]} : vector<8x256xf32> to vector<8x32xf32>
    %38 = vector.extract_strided_slice %7 {offsets = [0, 32], sizes = [8, 32], strides = [1, 1]} : vector<8x256xf32> to vector<8x32xf32>
    %cst_18 = arith.constant dense<0.000000e+00> : vector<8x8xf32>
    %39 = tpu.matmul %37, %38, %cst_18 {dimension_numbers = #tpu.dot_dimension_numbers<[1], [1], [0], [0], [0, 0, 1, 0], [], []>} : vector<8x32xf32>, vector<8x32xf32>, vector<8x8xf32> -> vector<8x8xf32>
    %cst_19 = arith.constant -1.000000e+30 : f32
    %40 = vector.broadcast %cst_19 : f32 to vector<8x8xf32>
    %41 = arith.select %19, %39, %40 : vector<8x8xi1>, vector<8x8xf32>
    %cst_20 = arith.constant dense<0xFF800000> : vector<8xf32>
    %42 = vector.multi_reduction <maximumf>, %41, %cst_20 [1] : vector<8x8xf32> to vector<8xf32>
    %43 = vector.shape_cast %42 : vector<8xf32> to vector<8x1xf32>
    %44 = vector.broadcast %43 : vector<8x1xf32> to vector<8x8xf32>
    %45 = arith.subf %41, %44 : vector<8x8xf32>
    %46 = math.exp %45 : vector<8x8xf32>
    %cst_21 = arith.constant dense<0.000000e+00> : vector<8xf32>
    %47 = vector.multi_reduction <add>, %46, %cst_21 [1] : vector<8x8xf32> to vector<8xf32>
    %48 = vector.shape_cast %47 : vector<8xf32> to vector<8x1xf32>
    %49 = tpu.reciprocal %48 : vector<8x1xf32> -> vector<8x1xf32>
    %50 = vector.broadcast %49 : vector<8x1xf32> to vector<8x8xf32>
    %51 = arith.mulf %46, %50 : vector<8x8xf32>
    %52 = vector.extract_strided_slice %8 {offsets = [0, 32], sizes = [8, 32], strides = [1, 1]} : vector<8x256xf32> to vector<8x32xf32>
    %cst_22 = arith.constant dense<0.000000e+00> : vector<8x32xf32>
    %53 = tpu.matmul %51, %52, %cst_22 {dimension_numbers = #tpu.dot_dimension_numbers<[1], [0], [0], [1], [0, 0, 1, 1], [], []>} : vector<8x8xf32>, vector<8x32xf32>, vector<8x32xf32> -> vector<8x32xf32>
    %54 = vector.extract_strided_slice %6 {offsets = [0, 64], sizes = [8, 32], strides = [1, 1]} : vector<8x256xf32> to vector<8x32xf32>
    %55 = vector.extract_strided_slice %7 {offsets = [0, 64], sizes = [8, 32], strides = [1, 1]} : vector<8x256xf32> to vector<8x32xf32>
    %cst_23 = arith.constant dense<0.000000e+00> : vector<8x8xf32>
    %56 = tpu.matmul %54, %55, %cst_23 {dimension_numbers = #tpu.dot_dimension_numbers<[1], [1], [0], [0], [0, 0, 1, 0], [], []>} : vector<8x32xf32>, vector<8x32xf32>, vector<8x8xf32> -> vector<8x8xf32>
    %cst_24 = arith.constant -1.000000e+30 : f32
    %57 = vector.broadcast %cst_24 : f32 to vector<8x8xf32>
    %58 = arith.select %19, %56, %57 : vector<8x8xi1>, vector<8x8xf32>
    %cst_25 = arith.constant dense<0xFF800000> : vector<8xf32>
    %59 = vector.multi_reduction <maximumf>, %58, %cst_25 [1] : vector<8x8xf32> to vector<8xf32>
    %60 = vector.shape_cast %59 : vector<8xf32> to vector<8x1xf32>
    %61 = vector.broadcast %60 : vector<8x1xf32> to vector<8x8xf32>
    %62 = arith.subf %58, %61 : vector<8x8xf32>
    %63 = math.exp %62 : vector<8x8xf32>
    %cst_26 = arith.constant dense<0.000000e+00> : vector<8xf32>
    %64 = vector.multi_reduction <add>, %63, %cst_26 [1] : vector<8x8xf32> to vector<8xf32>
    %65 = vector.shape_cast %64 : vector<8xf32> to vector<8x1xf32>
    %66 = tpu.reciprocal %65 : vector<8x1xf32> -> vector<8x1xf32>
    %67 = vector.broadcast %66 : vector<8x1xf32> to vector<8x8xf32>
    %68 = arith.mulf %63, %67 : vector<8x8xf32>
    %69 = vector.extract_strided_slice %8 {offsets = [0, 64], sizes = [8, 32], strides = [1, 1]} : vector<8x256xf32> to vector<8x32xf32>
    %cst_27 = arith.constant dense<0.000000e+00> : vector<8x32xf32>
    %70 = tpu.matmul %68, %69, %cst_27 {dimension_numbers = #tpu.dot_dimension_numbers<[1], [0], [0], [1], [0, 0, 1, 1], [], []>} : vector<8x8xf32>, vector<8x32xf32>, vector<8x32xf32> -> vector<8x32xf32>
    %71 = vector.extract_strided_slice %6 {offsets = [0, 96], sizes = [8, 32], strides = [1, 1]} : vector<8x256xf32> to vector<8x32xf32>
    %72 = vector.extract_strided_slice %7 {offsets = [0, 96], sizes = [8, 32], strides = [1, 1]} : vector<8x256xf32> to vector<8x32xf32>
    %cst_28 = arith.constant dense<0.000000e+00> : vector<8x8xf32>
    %73 = tpu.matmul %71, %72, %cst_28 {dimension_numbers = #tpu.dot_dimension_numbers<[1], [1], [0], [0], [0, 0, 1, 0], [], []>} : vector<8x32xf32>, vector<8x32xf32>, vector<8x8xf32> -> vector<8x8xf32>
    %cst_29 = arith.constant -1.000000e+30 : f32
    %74 = vector.broadcast %cst_29 : f32 to vector<8x8xf32>
    %75 = arith.select %19, %73, %74 : vector<8x8xi1>, vector<8x8xf32>
    %cst_30 = arith.constant dense<0xFF800000> : vector<8xf32>
    %76 = vector.multi_reduction <maximumf>, %75, %cst_30 [1] : vector<8x8xf32> to vector<8xf32>
    %77 = vector.shape_cast %76 : vector<8xf32> to vector<8x1xf32>
    %78 = vector.broadcast %77 : vector<8x1xf32> to vector<8x8xf32>
    %79 = arith.subf %75, %78 : vector<8x8xf32>
    %80 = math.exp %79 : vector<8x8xf32>
    %cst_31 = arith.constant dense<0.000000e+00> : vector<8xf32>
    %81 = vector.multi_reduction <add>, %80, %cst_31 [1] : vector<8x8xf32> to vector<8xf32>
    %82 = vector.shape_cast %81 : vector<8xf32> to vector<8x1xf32>
    %83 = tpu.reciprocal %82 : vector<8x1xf32> -> vector<8x1xf32>
    %84 = vector.broadcast %83 : vector<8x1xf32> to vector<8x8xf32>
    %85 = arith.mulf %80, %84 : vector<8x8xf32>
    %86 = vector.extract_strided_slice %8 {offsets = [0, 96], sizes = [8, 32], strides = [1, 1]} : vector<8x256xf32> to vector<8x32xf32>
    %cst_32 = arith.constant dense<0.000000e+00> : vector<8x32xf32>
    %87 = tpu.matmul %85, %86, %cst_32 {dimension_numbers = #tpu.dot_dimension_numbers<[1], [0], [0], [1], [0, 0, 1, 1], [], []>} : vector<8x8xf32>, vector<8x32xf32>, vector<8x32xf32> -> vector<8x32xf32>
    %88 = vector.extract_strided_slice %6 {offsets = [0, 128], sizes = [8, 32], strides = [1, 1]} : vector<8x256xf32> to vector<8x32xf32>
    %89 = vector.extract_strided_slice %7 {offsets = [0, 128], sizes = [8, 32], strides = [1, 1]} : vector<8x256xf32> to vector<8x32xf32>
    %cst_33 = arith.constant dense<0.000000e+00> : vector<8x8xf32>
    %90 = tpu.matmul %88, %89, %cst_33 {dimension_numbers = #tpu.dot_dimension_numbers<[1], [1], [0], [0], [0, 0, 1, 0], [], []>} : vector<8x32xf32>, vector<8x32xf32>, vector<8x8xf32> -> vector<8x8xf32>
    %cst_34 = arith.constant -1.000000e+30 : f32
    %91 = vector.broadcast %cst_34 : f32 to vector<8x8xf32>
    %92 = arith.select %19, %90, %91 : vector<8x8xi1>, vector<8x8xf32>
    %cst_35 = arith.constant dense<0xFF800000> : vector<8xf32>
    %93 = vector.multi_reduction <maximumf>, %92, %cst_35 [1] : vector<8x8xf32> to vector<8xf32>
    %94 = vector.shape_cast %93 : vector<8xf32> to vector<8x1xf32>
    %95 = vector.broadcast %94 : vector<8x1xf32> to vector<8x8xf32>
    %96 = arith.subf %92, %95 : vector<8x8xf32>
    %97 = math.exp %96 : vector<8x8xf32>
    %cst_36 = arith.constant dense<0.000000e+00> : vector<8xf32>
    %98 = vector.multi_reduction <add>, %97, %cst_36 [1] : vector<8x8xf32> to vector<8xf32>
    %99 = vector.shape_cast %98 : vector<8xf32> to vector<8x1xf32>
    %100 = tpu.reciprocal %99 : vector<8x1xf32> -> vector<8x1xf32>
    %101 = vector.broadcast %100 : vector<8x1xf32> to vector<8x8xf32>
    %102 = arith.mulf %97, %101 : vector<8x8xf32>
    %103 = vector.extract_strided_slice %8 {offsets = [0, 128], sizes = [8, 32], strides = [1, 1]} : vector<8x256xf32> to vector<8x32xf32>
    %cst_37 = arith.constant dense<0.000000e+00> : vector<8x32xf32>
    %104 = tpu.matmul %102, %103, %cst_37 {dimension_numbers = #tpu.dot_dimension_numbers<[1], [0], [0], [1], [0, 0, 1, 1], [], []>} : vector<8x8xf32>, vector<8x32xf32>, vector<8x32xf32> -> vector<8x32xf32>
    %105 = vector.extract_strided_slice %6 {offsets = [0, 160], sizes = [8, 32], strides = [1, 1]} : vector<8x256xf32> to vector<8x32xf32>
    %106 = vector.extract_strided_slice %7 {offsets = [0, 160], sizes = [8, 32], strides = [1, 1]} : vector<8x256xf32> to vector<8x32xf32>
    %cst_38 = arith.constant dense<0.000000e+00> : vector<8x8xf32>
    %107 = tpu.matmul %105, %106, %cst_38 {dimension_numbers = #tpu.dot_dimension_numbers<[1], [1], [0], [0], [0, 0, 1, 0], [], []>} : vector<8x32xf32>, vector<8x32xf32>, vector<8x8xf32> -> vector<8x8xf32>
    %cst_39 = arith.constant -1.000000e+30 : f32
    %108 = vector.broadcast %cst_39 : f32 to vector<8x8xf32>
    %109 = arith.select %19, %107, %108 : vector<8x8xi1>, vector<8x8xf32>
    %cst_40 = arith.constant dense<0xFF800000> : vector<8xf32>
    %110 = vector.multi_reduction <maximumf>, %109, %cst_40 [1] : vector<8x8xf32> to vector<8xf32>
    %111 = vector.shape_cast %110 : vector<8xf32> to vector<8x1xf32>
    %112 = vector.broadcast %111 : vector<8x1xf32> to vector<8x8xf32>
    %113 = arith.subf %109, %112 : vector<8x8xf32>
    %114 = math.exp %113 : vector<8x8xf32>
    %cst_41 = arith.constant dense<0.000000e+00> : vector<8xf32>
    %115 = vector.multi_reduction <add>, %114, %cst_41 [1] : vector<8x8xf32> to vector<8xf32>
    %116 = vector.shape_cast %115 : vector<8xf32> to vector<8x1xf32>
    %117 = tpu.reciprocal %116 : vector<8x1xf32> -> vector<8x1xf32>
    %118 = vector.broadcast %117 : vector<8x1xf32> to vector<8x8xf32>
    %119 = arith.mulf %114, %118 : vector<8x8xf32>
    %120 = vector.extract_strided_slice %8 {offsets = [0, 160], sizes = [8, 32], strides = [1, 1]} : vector<8x256xf32> to vector<8x32xf32>
    %cst_42 = arith.constant dense<0.000000e+00> : vector<8x32xf32>
    %121 = tpu.matmul %119, %120, %cst_42 {dimension_numbers = #tpu.dot_dimension_numbers<[1], [0], [0], [1], [0, 0, 1, 1], [], []>} : vector<8x8xf32>, vector<8x32xf32>, vector<8x32xf32> -> vector<8x32xf32>
    %122 = vector.extract_strided_slice %6 {offsets = [0, 192], sizes = [8, 32], strides = [1, 1]} : vector<8x256xf32> to vector<8x32xf32>
    %123 = vector.extract_strided_slice %7 {offsets = [0, 192], sizes = [8, 32], strides = [1, 1]} : vector<8x256xf32> to vector<8x32xf32>
    %cst_43 = arith.constant dense<0.000000e+00> : vector<8x8xf32>
    %124 = tpu.matmul %122, %123, %cst_43 {dimension_numbers = #tpu.dot_dimension_numbers<[1], [1], [0], [0], [0, 0, 1, 0], [], []>} : vector<8x32xf32>, vector<8x32xf32>, vector<8x8xf32> -> vector<8x8xf32>
    %cst_44 = arith.constant -1.000000e+30 : f32
    %125 = vector.broadcast %cst_44 : f32 to vector<8x8xf32>
    %126 = arith.select %19, %124, %125 : vector<8x8xi1>, vector<8x8xf32>
    %cst_45 = arith.constant dense<0xFF800000> : vector<8xf32>
    %127 = vector.multi_reduction <maximumf>, %126, %cst_45 [1] : vector<8x8xf32> to vector<8xf32>
    %128 = vector.shape_cast %127 : vector<8xf32> to vector<8x1xf32>
    %129 = vector.broadcast %128 : vector<8x1xf32> to vector<8x8xf32>
    %130 = arith.subf %126, %129 : vector<8x8xf32>
    %131 = math.exp %130 : vector<8x8xf32>
    %cst_46 = arith.constant dense<0.000000e+00> : vector<8xf32>
    %132 = vector.multi_reduction <add>, %131, %cst_46 [1] : vector<8x8xf32> to vector<8xf32>
    %133 = vector.shape_cast %132 : vector<8xf32> to vector<8x1xf32>
    %134 = tpu.reciprocal %133 : vector<8x1xf32> -> vector<8x1xf32>
    %135 = vector.broadcast %134 : vector<8x1xf32> to vector<8x8xf32>
    %136 = arith.mulf %131, %135 : vector<8x8xf32>
    %137 = vector.extract_strided_slice %8 {offsets = [0, 192], sizes = [8, 32], strides = [1, 1]} : vector<8x256xf32> to vector<8x32xf32>
    %cst_47 = arith.constant dense<0.000000e+00> : vector<8x32xf32>
    %138 = tpu.matmul %136, %137, %cst_47 {dimension_numbers = #tpu.dot_dimension_numbers<[1], [0], [0], [1], [0, 0, 1, 1], [], []>} : vector<8x8xf32>, vector<8x32xf32>, vector<8x32xf32> -> vector<8x32xf32>
    %139 = vector.extract_strided_slice %6 {offsets = [0, 224], sizes = [8, 32], strides = [1, 1]} : vector<8x256xf32> to vector<8x32xf32>
    %140 = vector.extract_strided_slice %7 {offsets = [0, 224], sizes = [8, 32], strides = [1, 1]} : vector<8x256xf32> to vector<8x32xf32>
    %cst_48 = arith.constant dense<0.000000e+00> : vector<8x8xf32>
    %141 = tpu.matmul %139, %140, %cst_48 {dimension_numbers = #tpu.dot_dimension_numbers<[1], [1], [0], [0], [0, 0, 1, 0], [], []>} : vector<8x32xf32>, vector<8x32xf32>, vector<8x8xf32> -> vector<8x8xf32>
    %cst_49 = arith.constant -1.000000e+30 : f32
    %142 = vector.broadcast %cst_49 : f32 to vector<8x8xf32>
    %143 = arith.select %19, %141, %142 : vector<8x8xi1>, vector<8x8xf32>
    %cst_50 = arith.constant dense<0xFF800000> : vector<8xf32>
    %144 = vector.multi_reduction <maximumf>, %143, %cst_50 [1] : vector<8x8xf32> to vector<8xf32>
    %145 = vector.shape_cast %144 : vector<8xf32> to vector<8x1xf32>
    %146 = vector.broadcast %145 : vector<8x1xf32> to vector<8x8xf32>
    %147 = arith.subf %143, %146 : vector<8x8xf32>
    %148 = math.exp %147 : vector<8x8xf32>
    %cst_51 = arith.constant dense<0.000000e+00> : vector<8xf32>
    %149 = vector.multi_reduction <add>, %148, %cst_51 [1] : vector<8x8xf32> to vector<8xf32>
    %150 = vector.shape_cast %149 : vector<8xf32> to vector<8x1xf32>
    %151 = tpu.reciprocal %150 : vector<8x1xf32> -> vector<8x1xf32>
    %152 = vector.broadcast %151 : vector<8x1xf32> to vector<8x8xf32>
    %153 = arith.mulf %148, %152 : vector<8x8xf32>
    %154 = vector.extract_strided_slice %8 {offsets = [0, 224], sizes = [8, 32], strides = [1, 1]} : vector<8x256xf32> to vector<8x32xf32>
    %cst_52 = arith.constant dense<0.000000e+00> : vector<8x32xf32>
    %155 = tpu.matmul %153, %154, %cst_52 {dimension_numbers = #tpu.dot_dimension_numbers<[1], [0], [0], [1], [0, 0, 1, 1], [], []>} : vector<8x8xf32>, vector<8x32xf32>, vector<8x32xf32> -> vector<8x32xf32>
    %156 = tpu.concatenate %36, %53, %70, %87, %104, %121, %138, %155 in 1 : vector<8x32xf32>, vector<8x32xf32>, vector<8x32xf32>, vector<8x32xf32>, vector<8x32xf32>, vector<8x32xf32>, vector<8x32xf32>, vector<8x32xf32> -> vector<8x256xf32>
    %c0_53 = arith.constant 0 : index
    %c0_54 = arith.constant 0 : index
    %157 = vector.load %arg5[%c0_53, %c0_54] : memref<256x32xf32, #tpu.memory_space<vmem>>, vector<256x32xf32>
    %cst_55 = arith.constant dense<0.000000e+00> : vector<8x32xf32>
    %158 = tpu.matmul %156, %157, %cst_55 {dimension_numbers = #tpu.dot_dimension_numbers<[1], [0], [0], [1], [0, 0, 1, 1], [], []>} : vector<8x256xf32>, vector<256x32xf32>, vector<8x32xf32> -> vector<8x32xf32>
    %c0_56 = arith.constant 0 : index
    %c0_57 = arith.constant 0 : index
    %159 = vector.load %arg6[%c0_56, %c0_57] : memref<1x32xf32, #tpu.memory_space<vmem>>, vector<1x32xf32>
    %160 = vector.broadcast %159 : vector<1x32xf32> to vector<8x32xf32>
    %161 = arith.addf %158, %160 : vector<8x32xf32>
    %162 = vector.shape_cast %161 : vector<8x32xf32> to vector<1x8x32xf32>
    %c0_58 = arith.constant 0 : index
    %c0_59 = arith.constant 0 : index
    %c0_60 = arith.constant 0 : index
    %163 = vector.load %arg7[%c0_58, %c0_59, %c0_60] : memref<1x8x32xf32, #tpu.memory_space<vmem>>, vector<1x8x32xf32>
    tpu.vector_store %arg7[%c0_58, %c0_59, %c0_60], %162 {strides = array<i32>} : memref<1x8x32xf32, #tpu.memory_space<vmem>>, vector<1x8x32xf32>,
    return
  }
  func.func @transform_0(%arg0: i32) -> (i32, i32, i32) {
    %c0_i32 = arith.constant 0 : i32
    %c0_i32_0 = arith.constant 0 : i32
    %c0_i32_1 = arith.constant 0 : i32
    return %arg0, %c0_i32, %c0_i32_0 : i32, i32, i32
  }
  func.func @transform_1(%arg0: i32) -> (i32, i32, i32) {
    %c0_i32 = arith.constant 0 : i32
    %c0_i32_0 = arith.constant 0 : i32
    %c0_i32_1 = arith.constant 0 : i32
    return %arg0, %c0_i32, %c0_i32_0 : i32, i32, i32
  }
  func.func @transform_2(%arg0: i32) -> (i32, i32, i32) {
    %c0_i32 = arith.constant 0 : i32
    %c0_i32_0 = arith.constant 0 : i32
    %c0_i32_1 = arith.constant 0 : i32
    return %arg0, %c0_i32, %c0_i32_0 : i32, i32, i32
  }
  func.func @transform_3(%arg0: i32) -> (i32, i32) {
    %c0_i32 = arith.constant 0 : i32
    %c0_i32_0 = arith.constant 0 : i32
    %c0_i32_1 = arith.constant 0 : i32
    return %c0_i32, %c0_i32_0 : i32, i32
  }
  func.func @transform_4(%arg0: i32) -> (i32, i32) {
    %c0_i32 = arith.constant 0 : i32
    %c0_i32_0 = arith.constant 0 : i32
    %c0_i32_1 = arith.constant 0 : i32
    return %c0_i32, %c0_i32_0 : i32, i32
  }
  func.func @transform_5(%arg0: i32) -> (i32, i32) {
    %c0_i32 = arith.constant 0 : i32
    %c0_i32_0 = arith.constant 0 : i32
    %c0_i32_1 = arith.constant 0 : i32
    return %c0_i32, %c0_i32_0 : i32, i32
  }
  func.func @transform_6(%arg0: i32) -> (i32, i32, i32) {
    %c0_i32 = arith.constant 0 : i32
    %c0_i32_0 = arith.constant 0 : i32
    %c0_i32_1 = arith.constant 0 : i32
    return %arg0, %c0_i32, %c0_i32_0 : i32, i32, i32
  }
}

</mosaic_0001>

<bundles_post_ra>
// kernel: tpu_custom_call.1
= control target key start
LH: loop header
LB: loop body
LE: loop exit
PB: predicated region body
PF: predicated region fallthrough
CT: control target
= control target key end

     0   :  { %11 = vsyncpa [#allocation3], 0  ;;  %s2922_s0 = inlined_call_operand.vmem [shape: f32[2,8,32], index: 0, kind: input, shape index: {}]   ;;  %s2923_s1 = inlined_call_operand.vmem [shape: f32[2,8,1], index: 1, kind: input, shape index: {}]   ;;  %s2924_s2 = inlined_call_operand.vmem [shape: f32[2,1,8], index: 2, kind: input, shape index: {}]   ;;  %s2925_s3 = inlined_call_operand.vmem [shape: f32[32,768], index: 3, kind: input, shape index: {}]   ;;  %s2926_s4 = inlined_call_operand.vmem [shape: f32[256,32], index: 4, kind: input, shape index: {}]   ;;  %s2927_s5 = inlined_call_operand.vmem [shape: f32[1,32], index: 5, kind: input, shape index: {}]   ;;  %s2928_s6 = inlined_call_operand.hbm [shape: f32[2,8,32], index: 6, kind: output, shape index: {}]  }
   0x1   :  { %13 = vsyncpa [#allocation3 + $0x1], 0  ;;  %s2478_s21 = smov 0   ;;  %s2480_s22 = smov 0  }
   0x2   :  { %s2482_s23 = smov 0   ;;  %s2484_s24 = smov 0  }
   0x3 LB: > { %s2499_s25 = sadd.s32 4294967295, %s2434_s24   ;;  %s2095_s26 = sadd.s32 4294967294, %s2434_s24   ;;  %s2434_s24 = sphi %s2484_s24, %s2936_s24   ;;  %s2430_s23 = sphi %s2482_s23, %s2935_s23   ;;  %s2426_s22 = sphi %s2480_s22, %s2934_s22   ;;  %s2422_s21 = sphi %s2478_s21, %s2933_s21  }
   0x4   : > { %s2503_s27 = sadd.s32 1, %s2434_s24   ;;  %s167_s28 = sadd.s32 1, %s2430_s23 }
   0x5   : > { %s164_s29 = ssub.s32 %s2434_s24, %s2503_s27  ;;  %p177_p0 = scmp.ne.s32.totalorder %s2430_s23, %s2426_s22 }
   0x6   : > { %p165_p1 = scmp.eq.s32.totalorder %s164_s29, 0  ;;  %p178_p2 = scmp.eq.s32.totalorder %s2499_s25, 1 }
   0x7   : > { %p183_p3 = scmp.ne.s32.totalorder %s2426_s22, %s2422_s21  ;;  %p184_p4 = scmp.eq.s32.totalorder %s2095_s26, 1 }
   0x8   : > { %s2514_s30 = scalar_select %p165_p1, %s2430_s23, %s167_s28  }
   0x9   : > { %p2516_p5 = por %p178_p2, %p177_p0  ;;  %p2520_p6 = por %p184_p4, %p183_p3 }
   0xa   : > { %p2098_p7 = scmp.ge.s32.totalorder %s2434_s24, 1  ;;  %p231_p8 = scmp.lt.s32.totalorder %s2434_s24, 3 }
   0xc   : > { %p232_p9 = pnand %p2098_p7, %p231_p8 }
   0xd   : > { %p267_p10 = scmp.lt.s32.totalorder (!%p232_p9), %s2499_s25, 1  ;;  %s2439_s28 = smov (!%p232_p9), 64  }
   0xe   : > { %235 = sbr.rel (%p232_p9) target bundleno = 1450 (0x5aa), region = 44  ;;  %s2440_s29 = smov (!%p232_p9), 96  }
   0xf   : > { %s2441_s10 = smov (!%p232_p9), 32   ;;  %s2131_s26 = sshll.u32 (!%p232_p9), %s2499_s25, 7 }
  0x10   : > { %s2442_s16 = smov (!%p232_p9), [#allocation2]  }
  0x11   : > { %s2378_s17 = sshll.u32 (!%p232_p9), %s2442_s16, 4  ;;  %s2379_s17 = int_to_ptr.vmem [resolvable:$false] %s2378_s17 }
  0x13   : > { %v298_v0 = vld [vmem:[%s2925_s3 + $0x98] sm:$0xff]  ;;  %v297_v1 = vld [vmem:[%s2925_s3 + $0x90] sm:$0xff]  ;;  %v292_v2 = vld [vmem:[%s2925_s3 + $0x68] sm:$0xff]  ;;  %v2436_v4 = vmov 0.0   ;;  %s2544_s19 = scalar_select %p267_p10, %s2499_s25, 1  ;;  %vm303_vm0 = vcmask 261120   ;;  %v532_v48 = vlaneseq }
  0x14   : > { %331 = vmatprep.subr.mxu1 %v298_v0  ;;  %v291_v3 = vld [vmem:[%s2925_s3 + $0x60] sm:$0xff]  ;;  %371 = vmatprep.mubr.f32.mxu1 %v2436_v4  ;;  %v286_v5 = vld [vmem:[%s2925_s3 + $0x38] sm:$0xff]  ;;  %v285_v6 = vld [vmem:[%s2925_s3 + $0x30] sm:$0xff]  ;;  %vm2437_vm1 = vmmov 0   ;;  %v2438_v26 = vmov 0   ;;  %vm615_vm7 = vcmask 64512  }
  0x15   : > { %332 = vmatpush1.msra.mxu1 %v297_v1  ;;  %2211 = vmatprep.subr.mxu0 %v2436_v4  ;;  %v280_v7 = vld [vmem:[%s2925_s3 + $0x8] sm:$0xff]  ;;  %s2100_s9 = sshll.u32 %s2544_s19, 3  ;;  %v279_v8 = vld [vmem:[%s2925_s3] sm:$0xff]  ;;  %v294_v12 = vld [vmem:[%s2925_s3 + $0x78] sm:$0xff]  ;;  %s277_s15 = scalar_lea.vmem %s2924_s2, %s2544_s19  ;;  %v533_v50 = vshrl.u32 %v532_v48, 7  ;;  %vm1884_vm8 = vcmask 523264  }
  0x16   : > { %333 = vmatprep.subr.mxu1 %v292_v2  ;;  %s270_s14 = scalar_lea.vmem %s2922_s0, %s2100_s9  ;;  %v300_v10 = vld [vmem:[%s2925_s3 + $0xa8] sm:$0xff]  ;;  %v299_v11 = vld [vmem:[%s2925_s3 + $0xa0] sm:$0xff]  ;;  %v293_v13 = vld [vmem:[%s2925_s3 + $0x70] sm:$0xff]  ;;  %2213 = vmatprep.mubr.msk.f32.mxu0 %vm2437_vm1, %v2436_v4  ;;  %s274_s13 = scalar_lea.vmem %s2923_s1, %s2100_s9  ;;  %vm1886_vm9 = vcmask 785408  }
  0x17   : > { %334 = vmatpush1.msra.mxu1 %v291_v3  ;;  %v278_v9 = vld [vmem:[%s270_s14] sm:$0xff]  ;;  %v288_v14 = vld [vmem:[%s2925_s3 + $0x48] sm:$0xff]  ;;  %v282_v16 = vld [vmem:[%s2925_s3 + $0x18] sm:$0xff]  ;;  %2326 = vset.pattern.permute.xlu0 %v2438_v26  ;;  %v534_v51 = vsub.s32 0, %v533_v50  ;;  %s2013_s14 = scalar_lea.hbm %s2928_s6, %s2131_s26  ;;  %s2380_s25 = scalar_lea.vmem %s2379_s17, 256 }
  0x18   : > { %335 = vmatprep.subr.mxu1 %v286_v5  ;;  %v287_v15 = vld [vmem:[%s2925_s3 + $0x40] sm:$0xff]  ;;  %v281_v17 = vld [vmem:[%s2925_s3 + $0x10] sm:$0xff]  ;;  %v302_v18 = vld [vmem:[%s2925_s3 + $0xb8] sm:$0xff] }
  0x19   : > { %336 = vmatpush1.msra.mxu1 %v285_v6  ;;  %v301_v19 = vld [vmem:[%s2925_s3 + $0xb0] sm:$0xff]  ;;  %v296_v20 = vld [vmem:[%s2925_s3 + $0x88] sm:$0xff]  ;;  %v295_v21 = vld [vmem:[%s2925_s3 + $0x80] sm:$0xff] }
  0x1a   : > { %337 = vmatprep.subr.mxu1 %v280_v7  ;;  %v290_v22 = vld [vmem:[%s2925_s3 + $0x58] sm:$0xff]  ;;  %v289_v23 = vld [vmem:[%s2925_s3 + $0x50] sm:$0xff]  ;;  %v284_v24 = vld [vmem:[%s2925_s3 + $0x28] sm:$0xff] }
  0x1b   : > { %338 = vmatpush1.msra.mxu1 %v279_v8  ;;  %v283_v25 = vld [vmem:[%s2925_s3 + $0x20] sm:$0xff] }
  0x1c   : > { %2102 = vmatmul.mubr.msk.f32.vlgmr.msra.gmra.mxu1 %vm303_vm0, %v278_v9  ;;  %402 = vmatprep.subr.mxu1 %v300_v10  ;;  %v522_v33 = vld [vmem:[%s274_s13] sm:$0xff] }
  0x1d   : > { %403 = vmatpush1.msra.mxu1 %v299_v11  ;;  %442 = vmatprep.mubr.f32.mxu1 %v2436_v4  ;;  %vm523_vm2 = vcmp.gt.f32.partialorder %v522_v33, 0.0  ;;  %v524_v49 = vld [vmem:[%s277_s15] sm:$0x1] }
  0x1e   : > { %404 = vmatprep.subr.mxu1 %v294_v12  ;;  %v526_v34 = vsel %vm523_vm2, 1, %v2438_v26  ;;  %vm525_vm3 = vcmp.gt.f32.partialorder %v524_v49, 0.0 }
  0x1f   : > { %405 = vmatpush1.msra.mxu1 %v293_v13  ;;  %v531_v52 = vsel %vm525_vm3, 1, %v2438_v26 }
  0x20   : > { %406 = vmatprep.subr.mxu1 %v288_v14  ;;  %v535_v53 = vrot.slane %v531_v52, %v534_v51 }
  0x21   : > { %407 = vmatpush1.msra.mxu1 %v287_v15 }
  0x22   : > { %408 = vmatprep.subr.mxu1 %v282_v16  ;;  %vm536_vm4 = vcmp.eq.s32.totalorder %v535_v53, 1 }
  0x23   : > { %409 = vmatpush1.msra.mxu1 %v281_v17 }
  0x24   : > { %2103 = vmatmul.mubr.msk.f32.vlgmr.msra.gmra.mxu1 %vm303_vm0, %v278_v9  ;;  %473 = vmatprep.subr.mxu1 %v302_v18 }
  0x25   : > { %513 = vmatprep.mubr.f32.mxu1 %v2436_v4  ;;  %474 = vmatpush1.msra.mxu1 %v301_v19 }
  0x26   : > { %475 = vmatprep.subr.mxu1 %v296_v20 }
  0x27   : > { %476 = vmatpush1.msra.mxu1 %v295_v21 }
  0x28   : > { %477 = vmatprep.subr.mxu1 %v290_v22 }
  0x29   : > { %478 = vmatpush1.msra.mxu1 %v289_v23 }
  0x2a   : > { %479 = vmatprep.subr.mxu1 %v284_v24 }
  0x2b   : > { %480 = vmatpush1.msra.mxu1 %v283_v25 }
  0x2c   : > { %2104 = vmatmul.mubr.msk.f32.vlgmr.msra.gmra.mxu1 %vm303_vm0, %v278_v9  ;;  %2201 = vmatprep.subr.mxu1 %v2436_v4 }
  0x2d   : > { %2203 = vmatprep.mubr.msk.f32.mxu1 %vm2437_vm1, %v2436_v4 }
  0xdc   : > { %v373_v27 = vpop.f32.mrf.mxu1 }
  0xdd   : > { %v520_v30 = vmul.f32 0.17677669, %v373_v27 }
  0xde   : > { %v375_v28 = vpop.f32.mrf.mxu1 }
  0xdf   : > { %v521_v31 = vmul.f32 0.17677669, %v375_v28 }
  0xe4   : > { %v444_v29 = vpop.f32.mrf.mxu1 }
  0xe5   : > { %869 = vrot.lane.b32.xlu1 %v444_v29, %s2439_s28  ;;  %702 = vrot.lane.b32.xlu0 %v444_v29, %s2440_s29 }
  0xe6   : > { %2202 = vmatpush3.xpose.msk.msra.mxu1 %vm303_vm0, %v444_v29  ;;  %v446_v32 = vpop.f32.mrf.mxu1 }
  0xe7   : > { %2206 = vmatprep.subr.mxu1 %v2436_v4 }
  0xe9   : > { %2204 = vmatmul.mubr.msk.f32.vlgmr.msra.gmra.mxu1 %vm303_vm0, %v520_v30  ;;  %867 = vrot.lane.b32.xlu1 %v520_v30, %s2439_s28 }
  0xea   : > { %700 = vrot.lane.b32.xlu0 %v520_v30, %s2440_s29  ;;  %2208 = vmatprep.mubr.msk.f32.mxu1 %vm2437_vm1, %v2436_v4 }
  0xec   : > { %v2644_v35 = vpop.f32.mrf.mxu1 }
  0xed   : > { %1033 = vrot.lane.b32.xlu1 %v520_v30, %s2441_s10  ;;  %2207 = vmatpush3.msra.mxu1 %v2644_v35 }
  0xee   : > { %1035 = vrot.lane.b32.xlu0 %v444_v29, %s2441_s10  ;;  %2216 = vmatprep.subr.mxu1 %v2436_v4  ;;  %v2685_v55 = vpop.f32.mrf.mxu1 }
  0xf1   : > { %1360 = vrot.lane.b32.xlu1 %v521_v31, %s2440_s29 }
  0xf2   : > { %1362 = vrot.lane.b32.xlu0 %v446_v32, %s2440_s29 }
  0xf5   : > { %1527 = vrot.lane.b32.xlu1 %v521_v31, %s2439_s28 }
  0xf6   : > { %1529 = vrot.lane.b32.xlu0 %v446_v32, %s2439_s28 }
  0xf9   : > { %1693 = vrot.lane.b32.xlu1 %v521_v31, %s2441_s10 }
  0xfa   : > { %1695 = vrot.lane.b32.xlu0 %v446_v32, %s2441_s10 }
  0xfe   : > { %528 = vperm.xlu0 %2326, %v526_v34  }
 0x157   : > { %v870_v36 = vpop.permute.xlu1 %869  ;;  %v703_v37 = vpop.permute.xlu0 %702 }
 0x158   : > { %2212 = vmatpush3.xpose.msk.msra.mxu0 %vm303_vm0, %v703_v37 }
 0x159   : > { %2221 = vmatprep.subr.mxu0 %v2436_v4 }
 0x15b   : > { %v868_v38 = vpop.permute.xlu1 %867 }
 0x15c   : > { %v701_v39 = vpop.permute.xlu0 %700 }
 0x15d   : > { %2214 = vmatmul.mubr.msk.f32.vlgmr.msra.gmra.mxu0 %vm303_vm0, %v701_v39 }
 0x15e   : > { %2222 = vmatpush3.xpose.msk.msra.mxu0 %vm303_vm0, %v870_v36  ;;  %2223 = vmatprep.mubr.msk.f32.mxu0 %vm2437_vm1, %v2436_v4 }
 0x15f   : > { %2231 = vmatprep.subr.mxu0 %v2436_v4  ;;  %v1034_v41 = vpop.permute.xlu1 %1033 }
 0x160   : > { %v1036_v40 = vpop.permute.xlu0 %1035 }
 0x161   : > { %2224 = vmatmul.mubr.msk.f32.vlgmr.msra.gmra.mxu0 %vm303_vm0, %v868_v38 }
 0x162   : > { %2232 = vmatpush3.xpose.msk.msra.mxu0 %vm303_vm0, %v1036_v40  ;;  %2233 = vmatprep.mubr.msk.f32.mxu0 %vm2437_vm1, %v2436_v4 }
 0x163   : > { %2241 = vmatprep.subr.mxu0 %v2436_v4  ;;  %v1361_v43 = vpop.permute.xlu1 %1360 }
 0x164   : > { %v1363_v42 = vpop.permute.xlu0 %1362 }
 0x165   : > { %2234 = vmatmul.mubr.msk.f32.vlgmr.msra.gmra.mxu0 %vm303_vm0, %v1034_v41 }
 0x166   : > { %2242 = vmatpush3.xpose.msk.msra.mxu0 %vm303_vm0, %v446_v32  ;;  %2243 = vmatprep.mubr.msk.f32.mxu0 %vm2437_vm1, %v2436_v4 }
 0x167   : > { %2251 = vmatprep.subr.mxu0 %v2436_v4  ;;  %v1528_v45 = vpop.permute.xlu1 %1527 }
 0x168   : > { %v1530_v44 = vpop.permute.xlu0 %1529 }
 0x169   : > { %2244 = vmatmul.mubr.msk.f32.vlgmr.msra.gmra.mxu0 %vm303_vm0, %v521_v31 }
 0x16a   : > { %2252 = vmatpush3.xpose.msk.msra.mxu0 %vm303_vm0, %v1363_v42  ;;  %2253 = vmatprep.mubr.msk.f32.mxu0 %vm2437_vm1, %v2436_v4 }
 0x16b   : > { %2261 = vmatprep.subr.mxu0 %v2436_v4  ;;  %v1694_v47 = vpop.permute.xlu1 %1693 }
 0x16c   : > { %v1696_v46 = vpop.permute.xlu0 %1695 }
 0x16d   : > { %2254 = vmatmul.mubr.msk.f32.vlgmr.msra.gmra.mxu0 %vm303_vm0, %v1361_v43 }
 0x16e   : > { %2262 = vmatpush3.xpose.msk.msra.mxu0 %vm303_vm0, %v1530_v44  ;;  %2263 = vmatprep.mubr.msk.f32.mxu0 %vm2437_vm1, %v2436_v4 }
 0x16f   : > { %2271 = vmatprep.subr.mxu0 %v2436_v4 }
 0x171   : > { %2264 = vmatmul.mubr.msk.f32.vlgmr.msra.gmra.mxu0 %vm303_vm0, %v1528_v45 }
 0x172   : > { %2272 = vmatpush3.xpose.msk.msra.mxu0 %vm303_vm0, %v1696_v46  ;;  %2273 = vmatprep.mubr.msk.f32.mxu0 %vm2437_vm1, %v2436_v4 }
 0x175   : > { %2274 = vmatmul.mubr.msk.f32.vlgmr.msra.gmra.mxu0 %vm303_vm0, %v1694_v47 }
 0x179   : > { %v529_v54 = vpop.permute.xlu0 %528 }
 0x17a   : > { %vm530_vm5 = vcmp.eq.s32.totalorder %v529_v54, 1 }
 0x17b   : > { %vm2687_vm6 = vmand %vm530_vm5, %vm536_vm4 }
 0x1a9   : > { %v610_v57 = vpop.f32.mrf.mxu1 }
 0x1aa   : > { %v614_v58 = vsel %vm2687_vm6, %v610_v57, -1e+30 }
 0x1ab   : > { %v2205_v59 = vpop.f32.mrf.mxu1  ;;  %v616_v60 = vsel %vm615_vm7, %v614_v58, -inf }
 0x1ac   : > { %617 = vmax.xlane.f32.xlu1 %v616_v60 }
 0x21d   : > { %v774_v61 = vpop.f32.mrf.mxu0 }
 0x21e   : > { %v778_v62 = vsel %vm2687_vm6, %v774_v61, -1e+30 }
 0x21f   : > { %v2215_v63 = vpop.f32.mrf.mxu0  ;;  %v779_v0 = vsel %vm615_vm7, %v778_v62, -inf }
 0x220   : > { %780 = vmax.xlane.f32.xlu0 %v779_v0 }
 0x221   : > { %v941_v1 = vpop.f32.mrf.mxu0 }
 0x222   : > { %v945_v2 = vsel %vm2687_vm6, %v941_v1, -1e+30 }
 0x223   : > { %v2225_v3 = vpop.f32.mrf.mxu0  ;;  %v946_v5 = vsel %vm615_vm7, %v945_v2, -inf }
 0x224   : > { %947 = vmax.xlane.f32.xlu1 %v946_v5 }
 0x225   : > { %v1107_v6 = vpop.f32.mrf.mxu0 }
 0x226   : > { %v1111_v7 = vsel %vm2687_vm6, %v1107_v6, -1e+30 }
 0x227   : > { %v2235_v8 = vpop.f32.mrf.mxu0  ;;  %v1112_v9 = vsel %vm615_vm7, %v1111_v7, -inf }
 0x228   : > { %1113 = vmax.xlane.f32.xlu0 %v1112_v9 }
 0x229   : > { %v1271_v10 = vpop.f32.mrf.mxu0 }
 0x22a   : > { %v1275_v11 = vsel %vm2687_vm6, %v1271_v10, -1e+30 }
 0x22b   : > { %v2245_v12 = vpop.f32.mrf.mxu0  ;;  %v1276_v13 = vsel %vm615_vm7, %v1275_v11, -inf }
 0x22c   : > { %1277 = vmax.xlane.f32.xlu1 %v1276_v13 }
 0x22d   : > { %v1434_v14 = vpop.f32.mrf.mxu0 }
 0x22e   : > { %v1438_v15 = vsel %vm2687_vm6, %v1434_v14, -1e+30 }
 0x22f   : > { %v2255_v16 = vpop.f32.mrf.mxu0  ;;  %v1439_v17 = vsel %vm615_vm7, %v1438_v15, -inf }
 0x230   : > { %1440 = vmax.xlane.f32.xlu0 %v1439_v17 }
 0x231   : > { %v1601_v18 = vpop.f32.mrf.mxu0 }
 0x232   : > { %v1605_v19 = vsel %vm2687_vm6, %v1601_v18, -1e+30 }
 0x233   : > { %v2265_v20 = vpop.f32.mrf.mxu0  ;;  %v1606_v21 = vsel %vm615_vm7, %v1605_v19, -inf }
 0x234   : > { %1607 = vmax.xlane.f32.xlu1 %v1606_v21 }
 0x235   : > { %v1767_v22 = vpop.f32.mrf.mxu0  ;;  %v618_v26 = vpop.xlane.xlu1 %617 }
 0x236   : > { %v1771_v23 = vsel %vm2687_vm6, %v1767_v22, -1e+30  ;;  %v619_v27 = vsub.f32 %v614_v58, %v618_v26 }
 0x237   : > { %v2275_v24 = vpop.f32.mrf.mxu0  ;;  %v1772_v25 = vsel %vm615_vm7, %v1771_v23, -inf }
 0x238   : > { %1773 = vmax.xlane.f32.xlu0 %v1772_v25  ;;  %v620_v28 = vmul.f32 1.442695, %v619_v27 }
 0x23a   : > { %2342 = vpow2.f32 %v620_v28 }
 0x245   : > { %791 = vrot.lane.b32.xlu1 %v2644_v35, %s2440_s29 }
 0x247   : > { %v2343_v29 = vpop.eup %2342 }
 0x248   : > { %v622_v30 = vsel %vm615_vm7, %v2343_v29, 0.0 }
 0x269   : > { %623 = vadd.xlane.f32.xlu1 %v622_v30 }
 0x27a   : > { %1123 = vrot.lane.b32.xlu1 %v2644_v35, %s2441_s10 }
 0x2a9   : > { %v781_v31 = vpop.xlane.xlu0 %780 }
 0x2aa   : > { %v782_v32 = vsub.f32 %v778_v62, %v781_v31 }
 0x2ac   : > { %v783_v33 = vmul.f32 1.442695, %v782_v32 }
 0x2ad   : > { %v948_v34 = vpop.xlane.xlu1 %947 }
 0x2ae   : > { %2344 = vpow2.f32 %v783_v33  ;;  %v949_v36 = vsub.f32 %v945_v2, %v948_v34 }
 0x2b0   : > { %v950_v37 = vmul.f32 1.442695, %v949_v36  ;;  %v1922_v36 = vld [vmem:[%s2926_s4 + $0xf8] sm:$0xff] }
 0x2b1   : > { %v1114_v42 = vpop.xlane.xlu0 %1113  ;;  %2166 = vmatprep.subr.mxu0 %v1922_v36 }
 0x2b2   : > { %2346 = vpow2.f32 %v950_v37  ;;  %v1115_v43 = vsub.f32 %v1111_v7, %v1114_v42  ;;  %v1906_v37 = vld [vmem:[%s2926_s4 + $0x78] sm:$0xff]  ;;  %v1903_v42 = vld [vmem:[%s2926_s4 + $0x60] sm:$0xff] }
 0x2b3   : > { %2167 = vmatpush3.msra.mxu0 %v1906_v37 }
 0x2b4   : > { %v1116_v47 = vmul.f32 1.442695, %v1115_v43  ;;  %v1918_v43 = vld [vmem:[%s2926_s4 + $0xd8] sm:$0xff] }
 0x2b5   : > { %v1278_v44 = vpop.xlane.xlu1 %1277 }
 0x2b6   : > { %v1279_v46 = vsub.f32 %v1275_v11, %v1278_v44  ;;  %2348 = vpow2.f32 %v1116_v47  ;;  %v1902_v44 = vld [vmem:[%s2926_s4 + $0x58] sm:$0xff]  ;;  %v1916_v47 = vld [vmem:[%s2926_s4 + $0xc8] sm:$0xff] }
 0x2b8   : > { %v1280_v51 = vmul.f32 1.442695, %v1279_v46  ;;  %v1901_v46 = vld [vmem:[%s2926_s4 + $0x50] sm:$0xff] }
 0x2b9   : > { %v1441_v45 = vpop.xlane.xlu0 %1440 }
 0x2ba   : > { %v1442_v48 = vsub.f32 %v1438_v15, %v1441_v45  ;;  %2350 = vpow2.f32 %v1280_v51  ;;  %v1917_v45 = vld [vmem:[%s2926_s4 + $0xd0] sm:$0xff]  ;;  %v1914_v51 = vld [vmem:[%s2926_s4 + $0xb8] sm:$0xff] }
 0x2bb   : > { %v2345_v38 = vpop.eup %2344 }
 0x2bc   : > { %v785_v39 = vsel %vm615_vm7, %v2345_v38, 0.0  ;;  %v1443_v53 = vmul.f32 1.442695, %v1442_v48  ;;  %v1900_v48 = vld [vmem:[%s2926_s4 + $0x48] sm:$0xff] }
 0x2bd   : > { %786 = vadd.xlane.f32.xlu0 %v785_v39  ;;  %v1608_v49 = vpop.xlane.xlu1 %1607  ;;  %v1920_v39 = vld [vmem:[%s2926_s4 + $0xe8] sm:$0xff] }
 0x2be   : > { %v1609_v52 = vsub.f32 %v1605_v19, %v1608_v49  ;;  %2352 = vpow2.f32 %v1443_v53  ;;  %v1915_v49 = vld [vmem:[%s2926_s4 + $0xc0] sm:$0xff]  ;;  %v1913_v53 = vld [vmem:[%s2926_s4 + $0xb0] sm:$0xff] }
 0x2bf   : > { %v2721_v40 = vpop.eup %2346 }
 0x2c0   : > { %v952_v41 = vsel %vm615_vm7, %v2721_v40, 0.0  ;;  %v1610_v56 = vmul.f32 1.442695, %v1609_v52  ;;  %v1898_v52 = vld [vmem:[%s2926_s4 + $0x38] sm:$0xff] }
 0x2c1   : > { %953 = vadd.xlane.f32.xlu1 %v952_v41  ;;  %v1774_v50 = vpop.xlane.xlu0 %1773  ;;  %v792_v58 = vpop.permute.xlu1 %791  ;;  %v1919_v41 = vld [vmem:[%s2926_s4 + $0xe0] sm:$0xff] }
 0x2c2   : > { %v1775_v54 = vsub.f32 %v1771_v23, %v1774_v50  ;;  %2354 = vpow2.f32 %v1610_v56  ;;  %v1899_v50 = vld [vmem:[%s2926_s4 + $0x40] sm:$0xff] }
 0x2c4   : > { %v1776_v57 = vmul.f32 1.442695, %v1775_v54  ;;  %v1897_v54 = vld [vmem:[%s2926_s4 + $0x30] sm:$0xff] }
 0x2c6   : > { %2356 = vpow2.f32 %v1776_v57 }
 0x2d2   : > { %1451 = vrot.lane.b32.xlu1 %v2685_v55, %s2440_s29 }
 0x2d3   : > { %957 = vrot.lane.b32.xlu0 %v2644_v35, %s2439_s28  ;;  %v2349_v35 = vpop.eup %2348 }
 0x2d4   : > { %v2351_v59 = vpop.eup %2350  ;;  %v1118_v60 = vsel %vm615_vm7, %v2349_v35, 0.0 }
 0x2d5   : > { %v2730_v61 = vpop.eup %2352  ;;  %v1282_v1 = vsel %vm615_vm7, %v2351_v59, 0.0 }
 0x2d6   : > { %v2732_v63 = vpop.eup %2354  ;;  %v1445_v0 = vsel %vm615_vm7, %v2730_v61, 0.0 }
 0x2d7   : > { %v2737_v2 = vpop.eup %2356  ;;  %v1612_v5 = vsel %vm615_vm7, %v2732_v63, 0.0 }
 0x2d8   : > { %v1778_v3 = vsel %vm615_vm7, %v2737_v2, 0.0 }
 0x2f2   : > { %1119 = vadd.xlane.f32.xlu0 %v1118_v60  ;;  %v624_v62 = vpop.xlane.xlu1 %623 }
 0x2f3   : > { %2358 = vrcp.f32 %v624_v62  ;;  %v1911_v62 = vld [vmem:[%s2926_s4 + $0xa0] sm:$0xff] }
 0x2f6   : > { %1446 = vadd.xlane.f32.xlu0 %v1445_v0  ;;  %1283 = vadd.xlane.f32.xlu1 %v1282_v1  ;;  %v1124_v8 = vpop.permute.xlu1 %1123  ;;  %v1910_v1 = vld [vmem:[%s2926_s4 + $0x98] sm:$0xff] }
 0x2fa   : > { %1779 = vadd.xlane.f32.xlu0 %v1778_v3  ;;  %1613 = vadd.xlane.f32.xlu1 %v1612_v5  ;;  %v1909_v5 = vld [vmem:[%s2926_s4 + $0x90] sm:$0xff] }
 0x300   : > { %v2359_v6 = vpop.eup %2358 }
 0x301   : > { %v626_v7 = vmul.f32 %v2359_v6, %v2343_v29  ;;  %v1893_v6 = vld [vmem:[%s2926_s4 + $0x10] sm:$0xff] }
 0x303   : > { %2209 = vmatmul.mubr.msk.f32.vlgmr.msra.gmra.mxu1 %vm615_vm7, %v626_v7 }
 0x304   : > { %2217 = vmatpush3.msra.mxu1 %v792_v58  ;;  %2218 = vmatprep.mubr.msk.f32.mxu1 %vm2437_vm1, %v2436_v4 }
 0x305   : > { %2226 = vmatprep.subr.mxu1 %v2436_v4 }
 0x30b   : > { %1783 = vrot.lane.b32.xlu1 %v2685_v55, %s2441_s10 }
 0x310   : > { %1617 = vrot.lane.b32.xlu0 %v2685_v55, %s2439_s28 }
 0x346   : > { %v787_v9 = vpop.xlane.xlu0 %786 }
 0x347   : > { %2360 = vrcp.f32 %v787_v9  ;;  %v1892_v9 = vld [vmem:[%s2926_s4 + $0x8] sm:$0xff] }
 0x34a   : > { %v954_v10 = vpop.xlane.xlu1 %953  ;;  %v958_v13 = vpop.permute.xlu0 %957 }
 0x34b   : > { %2362 = vrcp.f32 %v954_v10  ;;  %v1907_v10 = vld [vmem:[%s2926_s4 + $0x80] sm:$0xff] }
 0x34e   : > { %v1452_v16 = vpop.permute.xlu1 %1451 }
 0x354   : > { %v2361_v11 = vpop.eup %2360 }
 0x355   : > { %v789_v12 = vmul.f32 %v2361_v11, %v2345_v38  ;;  %v1921_v38 = vld [vmem:[%s2926_s4 + $0xf0] sm:$0xff]  ;;  %v1891_v11 = vld [vmem:[%s2926_s4] sm:$0xff] }
 0x356   : > { %2168 = vmatprep.subr.mxu0 %v1921_v38  ;;  %v2129_v38 = vld [vmem:[%s2927_s5] ss:$0 sm:$0xff] }
 0x357   : > { %2219 = vmatmul.mubr.msk.f32.vlgmr.msra.gmra.mxu1 %vm615_vm7, %v789_v12 }
 0x358   : > { %v2363_v14 = vpop.eup %2362  ;;  %2227 = vmatpush3.msra.mxu1 %v958_v13  ;;  %2228 = vmatprep.mubr.msk.f32.mxu1 %vm2437_vm1, %v2436_v4 }
 0x359   : > { %2236 = vmatprep.subr.mxu1 %v2436_v4  ;;  %v956_v15 = vmul.f32 %v2363_v14, %v2721_v40  ;;  %v1904_v40 = vld [vmem:[%s2926_s4 + $0x68] sm:$0xff] }
 0x35b   : > { %2229 = vmatmul.mubr.msk.f32.vlgmr.msra.gmra.mxu1 %vm615_vm7, %v956_v15 }
 0x35c   : > { %2237 = vmatpush3.msra.mxu1 %v1124_v8  ;;  %2238 = vmatprep.mubr.msk.f32.mxu1 %vm2437_vm1, %v2436_v4  ;;  %v1908_v8 = vld [vmem:[%s2926_s4 + $0x88] sm:$0xff] }
 0x35d   : > { %2246 = vmatprep.subr.mxu1 %v2436_v4 }
 0x37b   : > { %v1120_v17 = vpop.xlane.xlu0 %1119 }
 0x37c   : > { %2364 = vrcp.f32 %v1120_v17 }
 0x37f   : > { %v1284_v18 = vpop.xlane.xlu1 %1283  ;;  %v1447_v19 = vpop.xlane.xlu0 %1446 }
 0x380   : > { %2366 = vrcp.f32 %v1284_v18 }
 0x381   : > { %2368 = vrcp.f32 %v1447_v19 }
 0x383   : > { %v1614_v20 = vpop.xlane.xlu1 %1613  ;;  %v1780_v21 = vpop.xlane.xlu0 %1779 }
 0x384   : > { %2370 = vrcp.f32 %v1614_v20 }
 0x385   : > { %2372 = vrcp.f32 %v1780_v21 }
 0x387   : > { %v1784_v31 = vpop.permute.xlu1 %1783 }
 0x389   : > { %v2365_v22 = vpop.eup %2364 }
 0x38a   : > { %v1122_v23 = vmul.f32 %v2365_v22, %v2349_v35 }
 0x38c   : > { %2239 = vmatmul.mubr.msk.f32.vlgmr.msra.gmra.mxu1 %vm615_vm7, %v1122_v23 }
 0x38d   : > { %2247 = vmatpush3.msra.mxu1 %v2685_v55  ;;  %2248 = vmatprep.mubr.msk.f32.mxu1 %vm2437_vm1, %v2436_v4  ;;  %v2367_v24 = vpop.eup %2366  ;;  %v1618_v55 = vpop.permute.xlu0 %1617 }
 0x38e   : > { %2256 = vmatprep.subr.mxu1 %v2436_v4  ;;  %v1286_v25 = vmul.f32 %v2367_v24, %v2351_v59  ;;  %v2369_v26 = vpop.eup %2368  ;;  %v1912_v59 = vld [vmem:[%s2926_s4 + $0xa8] sm:$0xff] }
 0x38f   : > { %v1449_v27 = vmul.f32 %v2369_v26, %v2730_v61  ;;  %v1896_v61 = vld [vmem:[%s2926_s4 + $0x28] sm:$0xff] }
 0x390   : > { %2249 = vmatmul.mubr.msk.f32.vlgmr.msra.gmra.mxu1 %vm615_vm7, %v1286_v25 }
 0x391   : > { %2257 = vmatpush3.msra.mxu1 %v1452_v16  ;;  %2258 = vmatprep.mubr.msk.f32.mxu1 %vm2437_vm1, %v2436_v4  ;;  %v2371_v28 = vpop.eup %2370 }
 0x392   : > { %2266 = vmatprep.subr.mxu1 %v2436_v4  ;;  %v1616_v29 = vmul.f32 %v2371_v28, %v2732_v63  ;;  %v2373_v30 = vpop.eup %2372  ;;  %v1895_v63 = vld [vmem:[%s2926_s4 + $0x20] sm:$0xff] }
 0x393   : > { %v1782_v32 = vmul.f32 %v2373_v30, %v2737_v2  ;;  %v1894_v2 = vld [vmem:[%s2926_s4 + $0x18] sm:$0xff] }
 0x394   : > { %2259 = vmatmul.mubr.msk.f32.vlgmr.msra.gmra.mxu1 %vm615_vm7, %v1449_v27 }
 0x395   : > { %2267 = vmatpush3.msra.mxu1 %v1618_v55  ;;  %2268 = vmatprep.mubr.msk.f32.mxu1 %vm2437_vm1, %v2436_v4 }
 0x396   : > { %2276 = vmatprep.subr.mxu1 %v2436_v4 }
 0x398   : > { %2269 = vmatmul.mubr.msk.f32.vlgmr.msra.gmra.mxu1 %vm615_vm7, %v1616_v29 }
 0x399   : > { %2277 = vmatpush3.msra.mxu1 %v1784_v31  ;;  %2278 = vmatprep.mubr.msk.f32.mxu1 %vm2437_vm1, %v2436_v4  ;;  %v1905_v4 = vld [vmem:[%s2926_s4 + $0x70] sm:$0xff] }
 0x39a   : > { %2169 = vmatpush3.msra.mxu0 %v1905_v4 }
 0x39b   : > { %2170 = vmatprep.subr.mxu0 %v1920_v39 }
 0x39c   : > { %2279 = vmatmul.mubr.msk.f32.vlgmr.msra.gmra.mxu1 %vm615_vm7, %v1782_v32  ;;  %2171 = vmatpush3.msra.mxu0 %v1904_v40 }
 0x39d   : > { %2172 = vmatprep.subr.mxu0 %v1919_v41 }
 0x39e   : > { %2173 = vmatpush3.msra.mxu0 %v1903_v42 }
 0x39f   : > { %2174 = vmatprep.subr.mxu0 %v1918_v43 }
 0x3a0   : > { %2175 = vmatpush3.msra.mxu0 %v1902_v44 }
 0x3a1   : > { %2176 = vmatprep.subr.mxu0 %v1917_v45 }
 0x3a2   : > { %2177 = vmatpush3.msra.mxu0 %v1901_v46 }
 0x3a3   : > { %2178 = vmatprep.subr.mxu0 %v1916_v47 }
 0x3a4   : > { %2179 = vmatpush3.msra.mxu0 %v1900_v48 }
 0x3a5   : > { %2180 = vmatprep.subr.mxu0 %v1915_v49 }
 0x3a6   : > { %2181 = vmatpush3.msra.mxu0 %v1899_v50 }
 0x3a7   : > { %2182 = vmatprep.subr.mxu0 %v1914_v51 }
 0x3a8   : > { %2183 = vmatpush3.msra.mxu0 %v1898_v52 }
 0x3a9   : > { %2184 = vmatprep.subr.mxu0 %v1913_v53 }
 0x3aa   : > { %2185 = vmatpush3.msra.mxu0 %v1897_v54 }
 0x3ab   : > { %2186 = vmatprep.subr.mxu0 %v1912_v59 }
 0x3ac   : > { %2187 = vmatpush3.msra.mxu0 %v1896_v61 }
 0x3ad   : > { %2188 = vmatprep.subr.mxu0 %v1911_v62 }
 0x3ae   : > { %2189 = vmatpush3.msra.mxu0 %v1895_v63 }
 0x3af   : > { %2190 = vmatprep.subr.mxu0 %v1910_v1 }
 0x3b0   : > { %2191 = vmatpush3.msra.mxu0 %v1894_v2 }
 0x3b1   : > { %2192 = vmatprep.subr.mxu0 %v1909_v5 }
 0x3b2   : > { %2193 = vmatpush3.msra.mxu0 %v1893_v6 }
 0x3b3   : > { %2194 = vmatprep.subr.mxu0 %v1908_v8 }
 0x3b4   : > { %2195 = vmatpush3.msra.mxu0 %v1892_v9 }
 0x3b5   : > { %2196 = vmatprep.subr.mxu0 %v1907_v10 }
 0x3b6   : > { %2197 = vmatpush3.msra.mxu0 %v1891_v11 }
 0x3c3   : > { %v2780_v33 = vpop.f32.mrf.mxu1 }
 0x3c5   : > { %v2210_v34 = vpop.f32.mrf.mxu1 }
 0x417   : > { %v863_v56 = vpop.f32.mrf.mxu1 }
 0x419   : > { %v2220_v57 = vpop.f32.mrf.mxu1 }
 0x41b   : > { %v1029_v35 = vpop.f32.mrf.mxu1 }
 0x41d   : > { %v2230_v58 = vpop.f32.mrf.mxu1 }
 0x44c   : > { %v1195_v60 = vpop.f32.mrf.mxu1 }
 0x44e   : > { %v2240_v0 = vpop.f32.mrf.mxu1 }
 0x450   : > { %v1356_v3 = vpop.f32.mrf.mxu1 }
 0x452   : > { %v2250_v7 = vpop.f32.mrf.mxu1 }
 0x454   : > { %v1523_v12 = vpop.f32.mrf.mxu1 }
 0x455   : > { %v2327_v13 = vpack.i.bf16 %v863_v56, %v1523_v12 }
 0x456   : > { %v2260_v14 = vpop.f32.mrf.mxu1 }
 0x457   : > { %2328 = vrot.lane.b32.xlu0 %v2327_v13, %s2441_s10 }
 0x458   : > { %v1689_v15 = vpop.f32.mrf.mxu1 }
 0x459   : > { %v2332_v16 = vpack.i.bf16 %v1029_v35, %v1689_v15 }
 0x45a   : > { %v2270_v17 = vpop.f32.mrf.mxu1 }
 0x45b   : > { %2333 = vrot.lane.b32.xlu1 %v2332_v16, %s2439_s28  ;;  %s264_s28 = sand.u32 1, %s2426_s22  }
 0x45c   : > { %v1855_v18 = vpop.f32.mrf.mxu1  ;;  %s2002_s15 = scalar_lea.sflag [#allocation3], %s264_s28 }
 0x45d   : > { %v2337_v19 = vpack.i.bf16 %v1195_v60, %v1855_v18 }
 0x45e   : > { %v2280_v20 = vpop.f32.mrf.mxu1 }
 0x45f   : > { %2338 = vrot.lane.b32.xlu0 %v2337_v19, %s2440_s29  ;;  %s2099_s29 = sshll.u32 %s264_s28, 3 }
 0x460   : > { %s266_s11 = scalar_lea.vmem [#allocation2], %s2099_s29 }
 0x461   : > { %s2015_s12 = sshll.u32 %s266_s11, 4  ;;  %s2016_s12 = int_to_ptr.vmem [resolvable:$true] %s2015_s12 }
 0x462   : > { %s2374_s19 = scalar_lea.vmem %s2016_s12, 128  ;;  %p2381_p0 = scmp.lt.s32.totalorder %s2016_s12, %s2379_s17 }
 0x463   : > { %p2375_p11 = scmp.ne.s32.totalorder %s2016_s12, %s2374_s19  ;;  %p2382_p1 = scmp.lt.s32.totalorder %s2380_s25, %s2374_s19 }
 0x465   : > { %p2376_p12 = pnand %p2375_p11, %p2516_p5  ;;  %p2383_p2 = por %p2382_p1, %p2381_p0 }
 0x467   : > { %p2377_p13 = pneg %p2376_p12 }
 0x469   : > { %p2384_p3 = pnand %p2383_p2, %p2377_p13 }
 0x4c9   : > { %v2329_v21 = vpop.permute.xlu0 %2328 }
 0x4ca   : > { %v2331_v23 = vunpack.i.h.bf16 %v2329_v21  ;;  %v2330_v24 = vunpack.i.l.bf16 %v2329_v21 }
 0x4cc   : > { %v1883_v28 = vsel %vm303_vm0, %v2780_v33, %v2331_v23  ;;  %v1888_v30 = vsel %vm303_vm0, %v1356_v3, %v2330_v24 }
 0x4cd   : > { %v2334_v22 = vpop.permute.xlu1 %2333 }
 0x4ce   : > { %v2336_v25 = vunpack.i.h.bf16 %v2334_v22  ;;  %v2335_v26 = vunpack.i.l.bf16 %v2334_v22 }
 0x4d0   : > { %v1885_v31 = vsel %vm1884_vm8, %v1883_v28, %v2336_v25  ;;  %v1889_v32 = vsel %vm1884_vm8, %v1888_v30, %v2335_v26 }
 0x4d1   : > { %v2339_v27 = vpop.permute.xlu0 %2338 }
 0x4d2   : > { %v2341_v55 = vunpack.i.h.bf16 %v2339_v27  ;;  %v2340_v29 = vunpack.i.l.bf16 %v2339_v27 }
 0x4d4   : > { %v1890_v34 = vsel %vm1886_vm9, %v1889_v32, %v2340_v29  ;;  %v1887_v36 = vsel %vm1886_vm9, %v1885_v31, %v2341_v55 }
 0x4d5   : > { %1994 = vmatprep.mubr.f32.mxu0 %v1890_v34 }
 0x4d6   : > { %1995 = vmatmul.mubr.f32.vlgmr.msra.gmra.mxu0 %v1887_v36 }
 0x596   : > { %v2198_v37 = vpop.f32.mrf.mxu0 }
 0x598   : > { %v2199_v4 = vpop.f32.mrf.mxu0 }
 0x599   : > { %v2200_v33 = vadd.f32 %v2199_v4, %v2198_v37 }
 0x59b   : > { %v1997_v39 = vadd.f32 %v2200_v33, %v2129_v38 }
 0x59d   : > { %2000 = vst.msk [vmem:[%s266_s11] sm:$0xff] %vm303_vm0, %v1997_v39 }
 0x59e   : > { %2387 = shalt.err (!%p2384_p3)
}
 0x59f   : > { %s2388_s18 = scalar_lea.hbm %s2013_s14, 128  ;;  %s2392_s10 = scalar_lea.hbm %s2928_s6, 256 }
 0x5a0   : > { %p2389_p4 = scmp.ne.s32.totalorder %s2013_s14, %s2388_s18  ;;  %p2393_p9 = scmp.lt.s32.totalorder %s2013_s14, %s2928_s6 }
 0x5a1   : > { %p2394_p10 = scmp.lt.s32.totalorder %s2392_s10, %s2388_s18 }
 0x5a2   : > { %p2390_p7 = pnand %p2389_p4, %p2516_p5 }
 0x5a3   : > { %p2395_p11 = por %p2394_p10, %p2393_p9 }
 0x5a4   : > { %p2391_p8 = pneg %p2390_p7 }
 0x5a6   : > { %p2396_p12 = pnand %p2395_p11, %p2391_p8 }
 0x5a8   : > { %2399 = shalt.err (!%p2396_p12)
}
 0x5a9   : > { %2281 = dma.vmem_to_hbm [thread:$0]  (%p2516_p5), %s2016_s12, 128, %s2013_s14, %s2002_s15  }
 0x5aa PF: > { %p2287_p13 = scmp.ge.s32.totalorder %s2434_s24, 2  ;;  %s2027_s11 = sand.u32 1, %s2422_s21  }
 0x5ab   : > { %s2028_s13 = scalar_lea.sflag [#allocation3], %s2027_s11 }
 0x5ac   : > { %p2284_p0 = pnand %p2287_p13, %p2520_p6 }
 0x5ae   : > { %p2285_p1 = pneg %p2284_p0 }
 0x5b0   : > { %2417 = dma.done.wait (%p2285_p1), %s2028_s13, 128  }
 0x5b1   : > { %2419 = vsyncadd (%p2285_p1), %s2028_s13, 4294967168  ;;  %p16_p2 = scmp.ge.s32.totalorder %s2503_s27, 4   ;;  %s2933_s21 = smov %s2426_s22 }
 0x5b2   : > { %s2934_s22 = smov %s2430_s23  ;;  %s2935_s23 = smov %s2514_s30 }
 0x5b3   : > { %s2936_s24 = smov %s2503_s27  ;;  %18 = sbr.rel (!%p16_p2) target bundleno = 3 (0x3), region = 85 }
 0x5b8   :  { %2033 = vsyncpa [#allocation3], 1 }
 0x5b9   :  { %2035 = vsyncpa [#allocation3 + $0x1], 1 }

</bundles_post_ra>
